<compile_context>
chip_gen: v6e
topology: v6e:2x2x1
jax: 0.10.0
libtpu: 0.0.40
codegen_flags: <defaults>
</compile_context>

<pallas_src>
import functools

import jax
import jax.numpy as jnp
from jax import lax
from jax.experimental import pallas as pl
from jax.experimental.pallas import tpu as pltpu


def _mlp_kernel_out1(x_ref, w1_ref, b1_ref, w2r_ref, b2_ref, o_ref, *,
                     n_chunks, chunk):
    """out_size == 1: second layer = VPU multiply + XLU lane reduction."""
    x = x_ref[...]                                    # (tb, Kp) bf16, loaded once

    def body(c, acc):
        off = pl.multiple_of(c * chunk, chunk)
        # hidden chunk = relu(x @ W1[:, off:off+chunk] + b1[chunk]) : MXU + VPU, f32
        hc = jnp.dot(x, w1_ref[:, pl.ds(off, chunk)],
                     preferred_element_type=jnp.float32)
        hc = jnp.maximum(hc + b1_ref[:, pl.ds(off, chunk)], 0.0)
        # accumulate the (tb, 1) partial dot with w2 (VPU mult + lane reduce)
        return acc + jnp.sum(hc * w2r_ref[:, pl.ds(off, chunk)],
                             axis=-1, keepdims=True)

    acc0 = jnp.zeros((x.shape[0], 1), jnp.float32)
    acc = lax.fori_loop(0, n_chunks, body, acc0, unroll=True)
    out = acc + b2_ref[...]
    # Lane-dense store (unmasked vst): broadcast the scalar column across 128
    # lanes; the wrapper slices [:, :1] outside.
    o_ref[...] = jnp.broadcast_to(out, o_ref.shape).astype(o_ref.dtype)


def _mlp_kernel_mxu(x_ref, w1_ref, b1_ref, w2_ref, b2_ref, o_ref, *,
                    n_chunks, chunk):
    """General out_size > 1: both layers on the MXU, bf16 operands, f32 acc."""
    x = x_ref[...]                                    # (tb, Kp) bf16

    def body(c, acc):
        off = pl.multiple_of(c * chunk, chunk)
        hc = jnp.dot(x, w1_ref[:, pl.ds(off, chunk)],
                     preferred_element_type=jnp.float32)
        hc = jnp.maximum(hc + b1_ref[:, pl.ds(off, chunk)], 0.0)
        return acc + jnp.dot(hc.astype(w2_ref.dtype),
                             w2_ref[pl.ds(off, chunk), :],
                             preferred_element_type=jnp.float32)

    acc0 = jnp.zeros(o_ref.shape, jnp.float32)
    acc = lax.fori_loop(0, n_chunks, body, acc0, unroll=True)
    o_ref[...] = (acc + b2_ref[...]).astype(o_ref.dtype)


def neural_network_forward(x, w1, b1, w2, b2, *, matmul_dtype=jnp.bfloat16,
                           block_b=2048, hidden_chunk=512):
    """x: (B, in_size); w1: (in_size, hidden); b1: (hidden,) or (1, hidden);
       w2: (hidden, out_size); b2: (out_size,) or (1, out_size) -> (B, out_size)."""
    B, in_size = x.shape
    hidden = w1.shape[1]
    out_size = w2.shape[1]

    b1 = jnp.asarray(b1, jnp.float32).reshape(1, hidden)
    b2 = jnp.asarray(b2, jnp.float32).reshape(1, out_size)

    # --- alignment & tiling ---------------------------------------------------
    # hidden lane-aligned (1000 -> 1024); in_size padded to a multiple of 64 so
    # the bf16 w1 block packs cleanly along sublanes (16-row packing).
    H = pl.cdiv(hidden, 128) * 128
    Kp = max(64, pl.cdiv(in_size, 64) * 64)
    # batch tile: >= 2 grid steps for large B (v7x two-TC "parallel" split),
    # capped at block_b; at B=8 this degenerates to a single 8-row step.
    tb = max(8, min(pl.cdiv(pl.cdiv(B, 2), 8) * 8, block_b))
    Bp = pl.cdiv(B, tb) * tb
    grid = (Bp // tb,)

    # hidden chunk size: largest power-of-two lane multiple <= hidden_chunk that
    # divides H, so each (tb, chunk) activation stays in vregs (no VMEM spill).
    chunk = hidden_chunk
    while H % chunk:
        chunk //= 2
    n_chunks = H // chunk

    # Pad + cast in the wrapper (zero padding is exact; results unchanged).
    x_p = jnp.pad(x.astype(jnp.float32),
                  ((0, Bp - B), (0, Kp - in_size))).astype(matmul_dtype)
    w1_p = jnp.pad(w1.astype(jnp.float32),
                   ((0, Kp - in_size), (0, H - hidden))).astype(matmul_dtype)
    b1_p = jnp.pad(b1, ((0, 0), (0, H - hidden)))

    itemsize = jnp.dtype(matmul_dtype).itemsize
    common_bytes = x_p.size * itemsize + w1_p.size * itemsize + b1_p.size * 4

    # Weights pinned to block (0, 0): VMEM-resident across all batch tiles.
    x_spec = pl.BlockSpec((tb, Kp), lambda i: (i, 0))
    w1_spec = pl.BlockSpec((Kp, H), lambda i: (0, 0))
    b1_spec = pl.BlockSpec((1, H), lambda i: (0, 0))
    cparams = pltpu.CompilerParams(dimension_semantics=("parallel",))

    if out_size == 1:
        OUT_LANES = 128
        # w2 as a (1, H) f32 row (~4 KiB); elementwise second layer stays f32.
        w2_row = jnp.pad(w2.astype(jnp.float32).reshape(1, hidden),
                         ((0, 0), (0, H - hidden)))
        cost = pl.CostEstimate(
            flops=2 * Bp * Kp * H + 2 * Bp * H,
            transcendentals=0,
            bytes_accessed=common_bytes + w2_row.size * 4 + b2.size * 4
                           + Bp * OUT_LANES * 4)
        kernel = functools.partial(_mlp_kernel_out1, n_chunks=n_chunks, chunk=chunk)
        out = pl.pallas_call(
            kernel,
            out_shape=jax.ShapeDtypeStruct((Bp, OUT_LANES), jnp.float32),
            grid=grid,
            in_specs=[
                x_spec,
                w1_spec,
                b1_spec,
                pl.BlockSpec((1, H), lambda i: (0, 0)),
                pl.BlockSpec((1, 1), lambda i: (0, 0)),
            ],
            out_specs=pl.BlockSpec((tb, OUT_LANES), lambda i: (i, 0)),
            compiler_params=cparams,
            cost_estimate=cost,
        )(x_p, w1_p, b1_p, w2_row, b2)
    else:
        Opad = pl.cdiv(out_size, 128) * 128
        # bf16 second-layer weights (f32 accumulation on the MXU).
        w2_p = jnp.pad(w2.astype(jnp.float32),
                       ((0, H - hidden), (0, Opad - out_size))).astype(matmul_dtype)
        b2_p = jnp.pad(b2, ((0, 0), (0, Opad - out_size)))
        cost = pl.CostEstimate(
            flops=2 * Bp * Kp * H + 2 * Bp * H * Opad,
            transcendentals=0,
            bytes_accessed=common_bytes + w2_p.size * itemsize + b2_p.size * 4
                           + Bp * Opad * 4)
        kernel = functools.partial(_mlp_kernel_mxu, n_chunks=n_chunks, chunk=chunk)
        out = pl.pallas_call(
            kernel,
            out_shape=jax.ShapeDtypeStruct((Bp, Opad), jnp.float32),
            grid=grid,
            in_specs=[
                x_spec,
                w1_spec,
                b1_spec,
                pl.BlockSpec((H, Opad), lambda i: (0, 0)),
                pl.BlockSpec((1, Opad), lambda i: (0, 0)),
            ],
            out_specs=pl.BlockSpec((tb, Opad), lambda i: (i, 0)),
            compiler_params=cparams,
            cost_estimate=cost,
        )(x_p, w1_p, b1_p, w2_p, b2_p)

    return out[:B, :out_size]


def init_params(key, in_size=50, hidden_size=1000, out_size=1):
    """Deterministic init mimicking nn.Linear default (uniform +/- 1/sqrt(fan_in))."""
    k1, k2, k3, k4 = jax.random.split(key, 4)
    bound1 = 1.0 / (in_size ** 0.5)
    bound2 = 1.0 / (hidden_size ** 0.5)
    w1 = jax.random.uniform(k1, (in_size, hidden_size), jnp.float32, -bound1, bound1)
    b1 = jax.random.uniform(k2, (hidden_size,), jnp.float32, -bound1, bound1)
    w2 = jax.random.uniform(k3, (hidden_size, out_size), jnp.float32, -bound2, bound2)
    b2 = jax.random.uniform(k4, (out_size,), jnp.float32, -bound2, bound2)
    return w1, b1, w2, b2


if __name__ == "__main__":
    key = jax.random.PRNGKey(0)
    k_x, k_p, k_p2 = jax.random.split(key, 3)

    # Shapes implied by the module defaults: in=50, hidden=1000, out=1.
    batch, in_size, hidden_size, out_size = 8, 50, 1000, 1
    x = jax.random.normal(k_x, (batch, in_size), jnp.float32)
    w1, b1, w2, b2 = init_params(k_p, in_size, hidden_size, out_size)

    out = neural_network_forward(x, w1, b1, w2, b2)
    out = jax.block_until_ready(out)
    assert out.shape == (batch, out_size)

    # Reference mirroring the kernel math (bf16 first-layer operands, f32 acc).
    xq = x.astype(jnp.bfloat16).astype(jnp.float32)
    w1q = w1.astype(jnp.bfloat16).astype(jnp.float32)
    ref_q = jnp.maximum(xq @ w1q + b1, 0.0) @ w2 + b2
    assert jnp.allclose(out, ref_q, atol=2e-3, rtol=2e-3)

    # Also close to the pure-f32 forward of the original module.
    ref_f32 = jnp.maximum(x @ w1 + b1, 0.0) @ w2 + b2
    assert jnp.allclose(out, ref_f32, atol=3e-2, rtol=3e-2)

    # Exercise the general (out_size > 1) MXU path as well (bf16 both layers).
    out_size2 = 8
    w1b, b1b, w2b, b2b = init_params(k_p2, in_size, hidden_size, out_size2)
    out2 = jax.block_until_ready(neural_network_forward(x, w1b, b1b, w2b, b2b))
    assert out2.shape == (batch, out_size2)
    hq = jnp.maximum(xq @ w1b.astype(jnp.bfloat16).astype(jnp.float32) + b1b, 0.0)
    ref2_q = (hq.astype(jnp.bfloat16).astype(jnp.float32)
              @ w2b.astype(jnp.bfloat16).astype(jnp.float32) + b2b)
    assert jnp.allclose(out2, ref2_q, atol=2e-2, rtol=2e-2)
    ref2_f32 = jnp.maximum(x @ w1b + b1b, 0.0) @ w2b + b2b
    assert jnp.allclose(out2, ref2_f32, atol=5e-2, rtol=5e-2)

    print("KERNEL_OK")
</pallas_src>

<mosaic_0001>
module attributes {stable_mosaic.version = 11 : i64} {
  func.func @_mlp_kernel_out1(%arg0: i32, %arg1: memref<8x64xbf16, #tpu.memory_space<vmem>>, %arg2: memref<64x1024xbf16, #tpu.memory_space<vmem>>, %arg3: memref<1x1024xf32, #tpu.memory_space<vmem>>, %arg4: memref<1x1024xf32, #tpu.memory_space<vmem>>, %arg5: memref<1x1xf32, #tpu.memory_space<vmem>>, %arg6: memref<8x128xf32, #tpu.memory_space<vmem>>) attributes {dimension_semantics = [#tpu.dimension_semantics<parallel>], iteration_bounds = array<i64: 1>, scalar_prefetch = 0 : i64, scratch_operands = 0 : i64, tpu.core_type = #tpu.core_type<tc>, window_params = [{transform_indices = @transform_0, window_bounds = array<i64: 8, 64>}, {pipeline_mode = #tpu.pipeline_mode<synchronous>, transform_indices = @transform_1, window_bounds = array<i64: 64, 1024>}, {pipeline_mode = #tpu.pipeline_mode<synchronous>, transform_indices = @transform_2, window_bounds = array<i64: 1, 1024>}, {pipeline_mode = #tpu.pipeline_mode<synchronous>, transform_indices = @transform_3, window_bounds = array<i64: 1, 1024>}, {pipeline_mode = #tpu.pipeline_mode<synchronous>, transform_indices = @transform_4, window_bounds = array<i64: 1, 1>}, {transform_indices = @transform_5, window_bounds = array<i64: 8, 128>}]} {
    %c0 = arith.constant 0 : index
    %c0_0 = arith.constant 0 : index
    %0 = vector.load %arg1[%c0, %c0_0] : memref<8x64xbf16, #tpu.memory_space<vmem>>, vector<8x64xbf16>
    %cst = arith.constant 0.000000e+00 : f32
    %1 = vector.broadcast %cst : f32 to vector<8x1xf32>
    %c0_i32 = arith.constant 0 : i32
    %c512_i32 = arith.constant 512 : i32
    %2 = arith.muli %c0_i32, %c512_i32 : i32
    %3 = tpu.assume_multiple %2, 512 : i32
    %c0_1 = arith.constant 0 : index
    %4 = arith.index_cast %3 : i32 to index
    %5 = vector.load %arg2[%c0_1, %4] : memref<64x1024xbf16, #tpu.memory_space<vmem>>, vector<64x512xbf16>
    %cst_2 = arith.constant dense<0.000000e+00> : vector<8x512xf32>
    %6 = tpu.matmul %0, %5, %cst_2 {dimension_numbers = #tpu.dot_dimension_numbers<[1], [0], [0], [1], [0, 0, 1, 1], [], []>} : vector<8x64xbf16>, vector<64x512xbf16>, vector<8x512xf32> -> vector<8x512xf32>
    %c0_3 = arith.constant 0 : index
    %7 = arith.index_cast %3 : i32 to index
    %8 = vector.load %arg3[%c0_3, %7] : memref<1x1024xf32, #tpu.memory_space<vmem>>, vector<1x512xf32>
    %9 = vector.broadcast %8 : vector<1x512xf32> to vector<8x512xf32>
    %10 = arith.addf %6, %9 : vector<8x512xf32>
    %cst_4 = arith.constant 0.000000e+00 : f32
    %11 = vector.broadcast %cst_4 : f32 to vector<8x512xf32>
    %12 = arith.maximumf %10, %11 : vector<8x512xf32>
    %c0_5 = arith.constant 0 : index
    %13 = arith.index_cast %3 : i32 to index
    %14 = vector.load %arg4[%c0_5, %13] : memref<1x1024xf32, #tpu.memory_space<vmem>>, vector<1x512xf32>
    %15 = vector.broadcast %14 : vector<1x512xf32> to vector<8x512xf32>
    %16 = arith.mulf %12, %15 : vector<8x512xf32>
    %cst_6 = arith.constant dense<0.000000e+00> : vector<8xf32>
    %17 = vector.multi_reduction <add>, %16, %cst_6 [1] : vector<8x512xf32> to vector<8xf32>
    %18 = vector.shape_cast %17 : vector<8xf32> to vector<8x1xf32>
    %19 = arith.addf %1, %18 : vector<8x1xf32>
    %c1_i32 = arith.constant 1 : i32
    %c512_i32_7 = arith.constant 512 : i32
    %20 = arith.muli %c1_i32, %c512_i32_7 : i32
    %21 = tpu.assume_multiple %20, 512 : i32
    %c0_8 = arith.constant 0 : index
    %22 = arith.index_cast %21 : i32 to index
    %23 = vector.load %arg2[%c0_8, %22] : memref<64x1024xbf16, #tpu.memory_space<vmem>>, vector<64x512xbf16>
    %cst_9 = arith.constant dense<0.000000e+00> : vector<8x512xf32>
    %24 = tpu.matmul %0, %23, %cst_9 {dimension_numbers = #tpu.dot_dimension_numbers<[1], [0], [0], [1], [0, 0, 1, 1], [], []>} : vector<8x64xbf16>, vector<64x512xbf16>, vector<8x512xf32> -> vector<8x512xf32>
    %c0_10 = arith.constant 0 : index
    %25 = arith.index_cast %21 : i32 to index
    %26 = vector.load %arg3[%c0_10, %25] : memref<1x1024xf32, #tpu.memory_space<vmem>>, vector<1x512xf32>
    %27 = vector.broadcast %26 : vector<1x512xf32> to vector<8x512xf32>
    %28 = arith.addf %24, %27 : vector<8x512xf32>
    %cst_11 = arith.constant 0.000000e+00 : f32
    %29 = vector.broadcast %cst_11 : f32 to vector<8x512xf32>
    %30 = arith.maximumf %28, %29 : vector<8x512xf32>
    %c0_12 = arith.constant 0 : index
    %31 = arith.index_cast %21 : i32 to index
    %32 = vector.load %arg4[%c0_12, %31] : memref<1x1024xf32, #tpu.memory_space<vmem>>, vector<1x512xf32>
    %33 = vector.broadcast %32 : vector<1x512xf32> to vector<8x512xf32>
    %34 = arith.mulf %30, %33 : vector<8x512xf32>
    %cst_13 = arith.constant dense<0.000000e+00> : vector<8xf32>
    %35 = vector.multi_reduction <add>, %34, %cst_13 [1] : vector<8x512xf32> to vector<8xf32>
    %36 = vector.shape_cast %35 : vector<8xf32> to vector<8x1xf32>
    %37 = arith.addf %19, %36 : vector<8x1xf32>
    %c2_i32 = arith.constant 2 : i32
    %c0_14 = arith.constant 0 : index
    %c0_15 = arith.constant 0 : index
    %38 = vector.load %arg5[%c0_14, %c0_15] : memref<1x1xf32, #tpu.memory_space<vmem>>, vector<1x1xf32>
    %39 = vector.broadcast %38 : vector<1x1xf32> to vector<8x1xf32>
    %40 = arith.addf %37, %39 : vector<8x1xf32>
    %41 = vector.shape_cast %40 : vector<8x1xf32> to vector<8x1xf32>
    %42 = vector.broadcast %41 : vector<8x1xf32> to vector<8x128xf32>
    %c0_16 = arith.constant 0 : index
    %c0_17 = arith.constant 0 : index
    %43 = vector.load %arg6[%c0_16, %c0_17] : memref<8x128xf32, #tpu.memory_space<vmem>>, vector<8x128xf32>
    tpu.vector_store %arg6[%c0_16, %c0_17], %42 {strides = array<i32>} : memref<8x128xf32, #tpu.memory_space<vmem>>, vector<8x128xf32>,
    return
  }
  func.func @transform_0(%arg0: i32) -> (i32, i32) {
    %c0_i32 = arith.constant 0 : i32
    %c0_i32_0 = arith.constant 0 : i32
    return %arg0, %c0_i32 : i32, i32
  }
  func.func @transform_1(%arg0: i32) -> (i32, i32) {
    %c0_i32 = arith.constant 0 : i32
    %c0_i32_0 = arith.constant 0 : i32
    %c0_i32_1 = arith.constant 0 : i32
    return %c0_i32, %c0_i32_0 : i32, i32
  }
  func.func @transform_2(%arg0: i32) -> (i32, i32) {
    %c0_i32 = arith.constant 0 : i32
    %c0_i32_0 = arith.constant 0 : i32
    %c0_i32_1 = arith.constant 0 : i32
    return %c0_i32, %c0_i32_0 : i32, i32
  }
  func.func @transform_3(%arg0: i32) -> (i32, i32) {
    %c0_i32 = arith.constant 0 : i32
    %c0_i32_0 = arith.constant 0 : i32
    %c0_i32_1 = arith.constant 0 : i32
    return %c0_i32, %c0_i32_0 : i32, i32
  }
  func.func @transform_4(%arg0: i32) -> (i32, i32) {
    %c0_i32 = arith.constant 0 : i32
    %c0_i32_0 = arith.constant 0 : i32
    %c0_i32_1 = arith.constant 0 : i32
    return %c0_i32, %c0_i32_0 : i32, i32
  }
  func.func @transform_5(%arg0: i32) -> (i32, i32) {
    %c0_i32 = arith.constant 0 : i32
    %c0_i32_0 = arith.constant 0 : i32
    return %arg0, %c0_i32 : i32, i32
  }
}

</mosaic_0001>

<bundles_post_ra>
// kernel: tpu_custom_call.1
= control target key start
LH: loop header
LB: loop body
LE: loop exit
PB: predicated region body
PF: predicated region fallthrough
CT: control target
= control target key end

     0   :  { %s817_s0 = inlined_call_operand.hbm [shape: bf16[8,64], index: 0, kind: input, shape index: {}]   ;;  %s818_s1 = inlined_call_operand.hbm [shape: bf16[64,1024], index: 1, kind: input, shape index: {}]   ;;  %s819_s2 = inlined_call_operand.hbm [shape: f32[1,1024], index: 2, kind: input, shape index: {}]   ;;  %s820_s3 = inlined_call_operand.hbm [shape: f32[1,1024], index: 3, kind: input, shape index: {}]   ;;  %s821_s4 = inlined_call_operand.<no memory space> [shape: f32[1,1], index: 4, kind: input, shape index: {}]   ;;  %s822_s5 = inlined_call_operand.hbm [shape: f32[8,128], index: 5, kind: output, shape index: {}]  }
   0x1   :  { %v10_v0 = vstv %s821_s4 }
   0x2   :  { %11 = vst [vmem:[#allocation2] sm:$0x1] %v10_v0 }
   0x3   :  { %12 = vsyncpa [#allocation4], 0 }
   0x4   :  { %13 = vsyncpa [#allocation7], 0 }
   0x5   :  { %14 = vsyncpa [#allocation10], 0 }
   0x6   :  { %15 = vsyncpa [#allocation5], 0  ;;  %s739_s20 = smov [#allocation6]  }
   0x7   :  { %s31_s21 = sshll.u32 %s739_s20, 4  ;;  %s32_s21 = int_to_ptr.vmem [resolvable:$true] %s31_s21 }
   0x8   :  { %s639_s22 = scalar_lea.vmem %s32_s21, 4096  ;;  %p644_p1 = scmp.lt.s32.totalorder %s32_s21, %s32_s21 }
   0x9   :  { %p640_p0 = scmp.ne.s32.totalorder %s32_s21, %s639_s22  ;;  %p645_p2 = scmp.lt.s32.totalorder %s639_s22, %s639_s22 }
   0xb   :  { %p646_p3 = por %p645_p2, %p644_p1 }
   0xd   :  { %p647_p4 = pnand %p646_p3, %p640_p0 }
   0xf   :  { %650 = shalt.err (!%p647_p4)
}
  0x10   :  { %s740_s23 = smov 512   ;;  %s741_s24 = smov 32  }
  0x11   :  { %37 = dma.hbm_to_vmem [thread:$0]  %s818_s1, 4096, %s32_s21, [#allocation7], %s740_s23, %s740_s23, %s741_s24  }
  0x12   :  { %s742_s4 = smov [#allocation3]   ;;  %s743_s28 = smov [#allocation8]  }
  0x13   :  { %s22_s27 = sshll.u32 %s742_s4, 4  ;;  %s44_s29 = sshll.u32 %s743_s28, 4  ;;  %s23_s27 = int_to_ptr.vmem [resolvable:$true] %s22_s27  ;;  %s45_s29 = int_to_ptr.vmem [resolvable:$true] %s44_s29 }
  0x14   :  { %s659_s30 = scalar_lea.vmem %s23_s27, 64  ;;  %p664_p6 = scmp.lt.s32.totalorder %s23_s27, %s23_s27 }
  0x15   :  { %p660_p5 = scmp.ne.s32.totalorder %s23_s27, %s659_s30  ;;  %p665_p7 = scmp.lt.s32.totalorder %s659_s30, %s659_s30 }
  0x17   :  { %p666_p8 = por %p665_p7, %p664_p6 }
  0x19   :  { %p667_p9 = pnand %p666_p8, %p660_p5 }
  0x1b   :  { %670 = shalt.err (!%p667_p9)
}
  0x1c   :  { %25 = dma.hbm_to_vmem [thread:$0]  %s817_s0, 64, %s23_s27, [#allocation4]  }
  0x1d   :  { %s679_s8 = scalar_lea.vmem %s45_s29, 128  ;;  %p684_p11 = scmp.lt.s32.totalorder %s45_s29, %s45_s29 }
  0x1e   :  { %p680_p10 = scmp.ne.s32.totalorder %s45_s29, %s679_s8  ;;  %p685_p12 = scmp.lt.s32.totalorder %s679_s8, %s679_s8 }
  0x20   :  { %p686_p13 = por %p685_p12, %p684_p11 }
  0x22   :  { %p687_p0 = pnand %p686_p13, %p680_p10 }
  0x24   :  { %690 = shalt.err (!%p687_p0)
}
  0x25   :  { %47 = dma.hbm_to_vmem [thread:$0]  %s819_s2, 128, %s45_s29, [#allocation7]  }
  0x26   :  { %s744_s10 = smov [#allocation9]  }
  0x27   :  { %s54_s11 = sshll.u32 %s744_s10, 4  ;;  %s55_s11 = int_to_ptr.vmem [resolvable:$true] %s54_s11 }
  0x28   :  { %s699_s12 = scalar_lea.vmem %s55_s11, 128  ;;  %p704_p2 = scmp.lt.s32.totalorder %s55_s11, %s55_s11 }
  0x29   :  { %p700_p1 = scmp.ne.s32.totalorder %s55_s11, %s699_s12  ;;  %p705_p3 = scmp.lt.s32.totalorder %s699_s12, %s699_s12 }
  0x2b   :  { %p706_p4 = por %p705_p3, %p704_p2 }
  0x2d   :  { %p707_p5 = pnand %p706_p4, %p700_p1 }
  0x2f   :  { %710 = shalt.err (!%p707_p5)
}
  0x30   :  { %57 = dma.hbm_to_vmem [thread:$0]  %s820_s3, 128, %s55_s11, [#allocation10]  }
  0x31   :  { %731 = dma.done.wait [#allocation4], 64  }
  0x32   :  { %732 = vsyncadd [#allocation4], 4294967232 }
  0x33   :  { %733 = dma.done.wait [#allocation7], 4224  }
  0x34   :  { %734 = vsyncadd [#allocation7], 4294963072 }
  0x35   :  { %735 = dma.done.wait [#allocation10], 128  }
  0x36   :  { %736 = vsyncadd [#allocation10], 4294967168  ;;  %v745_v1 = vmov 0   ;;  %v86_v2 = vld [vmem:[#allocation6 + $0xc0] sm:$0xff]  ;;  %v87_v4 = vld [vmem:[#allocation6 + $0xc8] sm:$0xff]  ;;  %vm192_vm0 = vcmask 523264  }
  0x37   :  { %228 = vmatprep.mubr.bf16.mxu0 %v745_v1  ;;  %269 = vmatprep.mubr.bf16.mxu1 %v745_v1  ;;  %v88_v3 = vld [vmem:[#allocation6 + $0xe0] sm:$0xff]  ;;  %v89_v6 = vld [vmem:[#allocation6 + $0xe8] sm:$0xff]  ;;  %v327_v32 = vld [vmem:[#allocation6 + $0xd0] sm:$0xff]  ;;  %s746_s2 = smov [#allocation11]  }
  0x38   :  { %629 = vset.pattern.permute.xlu1 %v745_v1  ;;  %630 = vset.pattern.permute.xlu0 %v745_v1  ;;  %v597_v5 = vcombine.high %v86_v2, %v88_v3  ;;  %v596_v7 = vcombine.low %v86_v2, %v88_v3  ;;  %v82_v8 = vld [vmem:[#allocation6 + $0x80] sm:$0xff]  ;;  %v599_v10 = vcombine.high %v87_v4, %v89_v6  ;;  %v83_v13 = vld [vmem:[#allocation6 + $0x88] sm:$0xff]  ;;  %v329_v33 = vld [vmem:[#allocation6 + $0xf0] sm:$0xff]  ;;  %s573_s3 = sshll.u32 %s746_s2, 4  ;;  %s574_s3 = int_to_ptr.vmem [resolvable:$true] %s573_s3 }
  0x39   :  { %v84_v9 = vld [vmem:[#allocation6 + $0xa0] sm:$0xff]  ;;  %v598_v11 = vcombine.low %v87_v4, %v89_v6  ;;  %v85_v14 = vld [vmem:[#allocation6 + $0xa8] sm:$0xff]  ;;  %v328_v34 = vld [vmem:[#allocation6 + $0xd8] sm:$0xff]  ;;  %v615_v38 = vcombine.high %v327_v32, %v329_v33  ;;  %v614_v45 = vcombine.low %v327_v32, %v329_v33  ;;  %s711_s14 = scalar_lea.vmem %s574_s3, 128  ;;  %p716_p7 = scmp.lt.s32.totalorder %s574_s3, %s574_s3 }
  0x3a   :  { %v593_v12 = vcombine.high %v82_v8, %v84_v9  ;;  %v78_v15 = vld [vmem:[#allocation6 + $0x40] sm:$0xff]  ;;  %204 = vmatprep.subr.bf16.mxu0 %v597_v5  ;;  %v595_v16 = vcombine.high %v83_v13, %v85_v14  ;;  %v79_v18 = vld [vmem:[#allocation6 + $0x48] sm:$0xff]  ;;  %245 = vmatprep.subr.bf16.mxu1 %v599_v10  ;;  %v592_v20 = vcombine.low %v82_v8, %v84_v9  ;;  %v330_v35 = vld [vmem:[#allocation6 + $0xf8] sm:$0xff]  ;;  %p712_p6 = scmp.ne.s32.totalorder %s574_s3, %s711_s14  ;;  %p717_p8 = scmp.lt.s32.totalorder %s711_s14, %s711_s14 }
  0x3b   :  { %v80_v17 = vld [vmem:[#allocation6 + $0x60] sm:$0xff]  ;;  %v81_v19 = vld [vmem:[#allocation6 + $0x68] sm:$0xff]  ;;  %205 = vmatpush1.bf16.msra.mxu0 %v596_v7  ;;  %246 = vmatpush1.bf16.msra.mxu1 %v598_v11  ;;  %v594_v21 = vcombine.low %v83_v13, %v85_v14  ;;  %v617_v39 = vcombine.high %v328_v34, %v330_v35  ;;  %v323_v40 = vld [vmem:[#allocation6 + $0x90] sm:$0xff]  ;;  %v616_v46 = vcombine.low %v328_v34, %v330_v35 }
  0x3c   :  { %206 = vmatprep.subr.bf16.mxu0 %v593_v12  ;;  %v589_v22 = vcombine.high %v78_v15, %v80_v17  ;;  %247 = vmatprep.subr.bf16.mxu1 %v595_v16  ;;  %v591_v23 = vcombine.high %v79_v18, %v81_v19  ;;  %v74_v24 = vld [vmem:[#allocation6] sm:$0xff]  ;;  %v75_v26 = vld [vmem:[#allocation6 + $0x8] sm:$0xff]  ;;  %v588_v28 = vcombine.low %v78_v15, %v80_v17  ;;  %v325_v41 = vld [vmem:[#allocation6 + $0xb0] sm:$0xff]  ;;  %p718_p9 = por %p717_p8, %p716_p7 }
  0x3d   :  { %v76_v25 = vld [vmem:[#allocation6 + $0x20] sm:$0xff]  ;;  %v77_v27 = vld [vmem:[#allocation6 + $0x28] sm:$0xff]  ;;  %v590_v29 = vcombine.low %v79_v18, %v81_v19  ;;  %v324_v42 = vld [vmem:[#allocation6 + $0x98] sm:$0xff]  ;;  %v611_v47 = vcombine.high %v323_v40, %v325_v41  ;;  %v610_v53 = vcombine.low %v323_v40, %v325_v41 }
  0x3e   :  { %v585_v30 = vcombine.high %v74_v24, %v76_v25  ;;  %v587_v31 = vcombine.high %v75_v26, %v77_v27  ;;  %v584_v36 = vcombine.low %v74_v24, %v76_v25  ;;  %v586_v37 = vcombine.low %v75_v26, %v77_v27  ;;  %v326_v43 = vld [vmem:[#allocation6 + $0xb8] sm:$0xff]  ;;  %v319_v49 = vld [vmem:[#allocation6 + $0x50] sm:$0xff]  ;;  %v90_v6 = vld [vmem:[#allocation8] sm:$0xf]  ;;  %p719_p10 = pnand %p718_p9, %p712_p6 }
  0x3f   :  { %207 = vmatpush1.bf16.msra.mxu0 %v592_v20  ;;  %248 = vmatpush1.bf16.msra.mxu1 %v594_v21  ;;  %v73_v44 = vld [vmem:[#allocation3] sm:$0xf]  ;;  %v613_v48 = vcombine.high %v324_v42, %v326_v43  ;;  %v321_v50 = vld [vmem:[#allocation6 + $0x70] sm:$0xff]  ;;  %v612_v54 = vcombine.low %v324_v42, %v326_v43  ;;  %v282_v11 = vld [vmem:[#allocation9] sm:$0xf] }
  0x40   :  { %208 = vmatprep.subr.bf16.mxu0 %v589_v22  ;;  %249 = vmatprep.subr.bf16.mxu1 %v591_v23  ;;  %v320_v51 = vld [vmem:[#allocation6 + $0x58] sm:$0xff]  ;;  %v607_v55 = vcombine.high %v319_v49, %v321_v50  ;;  %v315_v57 = vld [vmem:[#allocation6 + $0x10] sm:$0xff]  ;;  %v606_v61 = vcombine.low %v319_v49, %v321_v50  ;;  %v332_v40 = vld [vmem:[#allocation8 + $0x4] sm:$0xf] }
  0x41   :  { %v322_v52 = vld [vmem:[#allocation6 + $0x78] sm:$0xff]  ;;  %v317_v58 = vld [vmem:[#allocation6 + $0x30] sm:$0xff] }
  0x42   :  { %v609_v56 = vcombine.high %v320_v51, %v322_v52  ;;  %v316_v59 = vld [vmem:[#allocation6 + $0x18] sm:$0xff]  ;;  %v608_v62 = vcombine.low %v320_v51, %v322_v52  ;;  %v603_v63 = vcombine.high %v315_v57, %v317_v58  ;;  %v602_v2 = vcombine.low %v315_v57, %v317_v58 }
  0x43   :  { %209 = vmatpush1.bf16.msra.mxu0 %v588_v28  ;;  %250 = vmatpush1.bf16.msra.mxu1 %v590_v29  ;;  %v318_v60 = vld [vmem:[#allocation6 + $0x38] sm:$0xff] }
  0x44   :  { %210 = vmatprep.subr.bf16.mxu0 %v585_v30  ;;  %251 = vmatprep.subr.bf16.mxu1 %v587_v31  ;;  %v605_v0 = vcombine.high %v316_v59, %v318_v60  ;;  %v604_v3 = vcombine.low %v316_v59, %v318_v60 }
  0x47   :  { %211 = vmatpush1.bf16.msra.mxu0 %v584_v36  ;;  %252 = vmatpush1.bf16.msra.mxu1 %v586_v37 }
  0x48   :  { %442 = vmatprep.subr.bf16.mxu0 %v615_v38  ;;  %483 = vmatprep.subr.bf16.mxu1 %v617_v39 }
  0x4a   :  { %600 = vmatmul.mubr.msk.bf16.vlgmr.msra.gmra.mxu0 %vm192_vm0, %v73_v44  ;;  %601 = vmatmul.mubr.msk.bf16.vlgmr.msra.gmra.mxu1 %vm192_vm0, %v73_v44 }
  0x4b   :  { %443 = vmatpush1.bf16.msra.mxu0 %v614_v45  ;;  %484 = vmatpush1.bf16.msra.mxu1 %v616_v46  ;;  %v521_v45 = vld [vmem:[#allocation9 + $0x4] sm:$0xf] }
  0x4c   :  { %444 = vmatprep.subr.bf16.mxu0 %v611_v47  ;;  %485 = vmatprep.subr.bf16.mxu1 %v613_v48 }
  0x4d   :  { %466 = vmatprep.mubr.bf16.mxu0 %v745_v1  ;;  %507 = vmatprep.mubr.bf16.mxu1 %v745_v1  ;;  %v92_v1 = vlaneseq }
  0x4f   :  { %445 = vmatpush1.bf16.msra.mxu0 %v610_v53  ;;  %486 = vmatpush1.bf16.msra.mxu1 %v612_v54  ;;  %v93_v4 = vshrl.u32 %v92_v1, 7 }
  0x50   :  { %446 = vmatprep.subr.bf16.mxu0 %v607_v55  ;;  %487 = vmatprep.subr.bf16.mxu1 %v609_v56 }
  0x51   :  { %v802_v5 = vsub.s32 0, %v93_v4  ;;  %v102_v7 = vsub.s32 2, %v93_v4  ;;  %v98_v8 = vsub.s32 1, %v93_v4  ;;  %v804_v9 = vsub.s32 3, %v93_v4 }
  0x53   :  { %447 = vmatpush1.bf16.msra.mxu0 %v606_v61  ;;  %488 = vmatpush1.bf16.msra.mxu1 %v608_v62  ;;  %v95_v10 = vrot.slane %v90_v6, %v802_v5  ;;  %v103_v12 = vrot.slane %v90_v6, %v102_v7  ;;  %v99_v13 = vrot.slane %v90_v6, %v98_v8 }
  0x54   :  { %448 = vmatprep.subr.bf16.mxu0 %v603_v63  ;;  %489 = vmatprep.subr.bf16.mxu1 %v605_v0  ;;  %v107_v15 = vrot.slane %v90_v6, %v804_v9  ;;  %v287_v17 = vrot.slane %v282_v11, %v802_v5  ;;  %v295_v22 = vrot.slane %v282_v11, %v102_v7 }
  0x55   :  { %v291_v24 = vrot.slane %v282_v11, %v98_v8  ;;  %v299_v32 = vrot.slane %v282_v11, %v804_v9  ;;  %v337_v43 = vrot.slane %v332_v40, %v802_v5  ;;  %v341_v46 = vrot.slane %v332_v40, %v98_v8 }
  0x56   :  { %v349_v48 = vrot.slane %v332_v40, %v804_v9  ;;  %v526_v51 = vrot.slane %v521_v45, %v802_v5  ;;  %v534_v55 = vrot.slane %v521_v45, %v102_v7  ;;  %v530_v57 = vrot.slane %v521_v45, %v98_v8 }
  0x57   :  { %449 = vmatpush1.bf16.msra.mxu0 %v602_v2  ;;  %490 = vmatpush1.bf16.msra.mxu1 %v604_v3  ;;  %v538_v0 = vrot.slane %v521_v45, %v804_v9 }
  0x5a   :  { %618 = vmatmul.mubr.msk.bf16.vlgmr.msra.gmra.mxu0 %vm192_vm0, %v73_v44  ;;  %619 = vmatmul.mubr.msk.bf16.vlgmr.msra.gmra.mxu1 %vm192_vm0, %v73_v44  ;;  %v345_v44 = vrot.slane %v332_v40, %v102_v7 }
 0x10a   :  { %v230_v14 = vpop.f32.mrf.mxu0  ;;  %v271_v18 = vpop.f32.mrf.mxu1 }
 0x10b   :  { %v231_v16 = vadd.f32 %v230_v14, %v95_v10  ;;  %v272_v19 = vadd.f32 %v271_v18, %v103_v12  ;;  %v620_v14 = vld [vmem:[#allocation2] ss:$0 sm:$0xff] }
 0x10c   :  { %v232_v20 = vpop.f32.mrf.mxu0  ;;  %v273_v25 = vpop.f32.mrf.mxu1 }
 0x10d   :  { %v278_v21 = vmax.f32 %v231_v16, 0.0  ;;  %v233_v23 = vadd.f32 %v232_v20, %v99_v13  ;;  %v280_v26 = vmax.f32 %v272_v19, 0.0  ;;  %v274_v27 = vadd.f32 %v273_v25, %v107_v15 }
 0x10e   :  { %v234_v28 = vpop.f32.mrf.mxu0  ;;  %v275_v31 = vpop.f32.mrf.mxu1 }
 0x10f   :  { %v304_v29 = vmul.f32 %v287_v17, %v278_v21  ;;  %v279_v30 = vmax.f32 %v233_v23, 0.0  ;;  %v281_v33 = vmax.f32 %v274_v27, 0.0  ;;  %v306_v35 = vmul.f32 %v295_v22, %v280_v26 }
 0x110   :  { %v235_v34 = vpop.f32.mrf.mxu0  ;;  %v276_v37 = vpop.f32.mrf.mxu1 }
 0x111   :  { %v305_v36 = vmul.f32 %v291_v24, %v279_v30  ;;  %v307_v38 = vmul.f32 %v299_v32, %v281_v33 }
 0x113   :  { %v308_v39 = vadd.f32 %v305_v36, %v304_v29 }
 0x115   :  { %v309_v41 = vadd.f32 %v308_v39, %v306_v35 }
 0x117   :  { %v310_v42 = vadd.f32 %v309_v41, %v307_v38 }
 0x119   :  { %311 = vadd.xlane.f32.xlu0 %v310_v42 }
 0x11a   :  { %v468_v47 = vpop.f32.mrf.mxu0  ;;  %v509_v50 = vpop.f32.mrf.mxu1 }
 0x11b   :  { %v469_v49 = vadd.f32 %v468_v47, %v337_v43  ;;  %v510_v52 = vadd.f32 %v509_v50, %v345_v44 }
 0x11c   :  { %v470_v53 = vpop.f32.mrf.mxu0  ;;  %v511_v58 = vpop.f32.mrf.mxu1 }
 0x11d   :  { %v516_v54 = vmax.f32 %v469_v49, 0.0  ;;  %v471_v56 = vadd.f32 %v470_v53, %v341_v46  ;;  %v518_v59 = vmax.f32 %v510_v52, 0.0  ;;  %v512_v60 = vadd.f32 %v511_v58, %v349_v48 }
 0x11e   :  { %v472_v61 = vpop.f32.mrf.mxu0  ;;  %v513_v63 = vpop.f32.mrf.mxu1 }
 0x11f   :  { %v517_v62 = vmax.f32 %v471_v56, 0.0  ;;  %v543_v3 = vmul.f32 %v526_v51, %v516_v54  ;;  %v545_v1 = vmul.f32 %v534_v55, %v518_v59  ;;  %v519_v6 = vmax.f32 %v512_v60, 0.0 }
 0x120   :  { %v473_v2 = vpop.f32.mrf.mxu0  ;;  %v514_v5 = vpop.f32.mrf.mxu1 }
 0x121   :  { %v544_v4 = vmul.f32 %v530_v57, %v517_v62  ;;  %v546_v11 = vmul.f32 %v538_v0, %v519_v6 }
 0x123   :  { %v547_v10 = vadd.f32 %v544_v4, %v543_v3 }
 0x125   :  { %v548_v12 = vadd.f32 %v547_v10, %v545_v1 }
 0x127   :  { %v549_v7 = vadd.f32 %v548_v12, %v546_v11 }
 0x129   :  { %550 = vadd.xlane.f32.xlu0 %v549_v7 }
 0x1a2   :  { %v312_v8 = vpop.xlane.xlu0 %311 }
 0x1b2   :  { %v551_v13 = vpop.xlane.xlu0 %550 }
 0x1b3   :  { %v552_v15 = vadd.f32 %v551_v13, %v312_v8 }
 0x1b5   :  { %v560_v16 = vadd.f32 %v620_v14, %v552_v15 }
 0x1b7   :  { %563 = vperm.xlu1 %629, %v560_v16  }
 0x232   :  { %v564_v9 = vpop.permute.xlu1 %563 }
 0x233   :  { %566 = vst [vmem:[#allocation11] sm:$0xff] %v564_v9 }
 0x234   :  { %722 = shalt.err (!%p719_p10)
}
 0x235   :  { %576 = dma.vmem_to_hbm [thread:$0]  %s574_s3, 128, %s822_s5, [#allocation5]  }
 0x236   :  { %737 = dma.done.wait [#allocation5], 128  }
 0x237   :  { %738 = vsyncadd [#allocation5], 4294967168 }
 0x238   :  { %580 = vsyncpa [#allocation4], 1 }
 0x239   :  { %581 = vsyncpa [#allocation7], 1 }
 0x23a   :  { %582 = vsyncpa [#allocation10], 1 }
 0x23b   :  { %583 = vsyncpa [#allocation5], 1 }

</bundles_post_ra>
